<compile_context>
chip_gen: v7x
topology: tpu7x:2x2x1
jax: 0.10.0
libtpu: 0.0.40
codegen_flags: <defaults>
</compile_context>

<pallas_src>
import jax
import jax.numpy as jnp
from jax.experimental import pallas as pl
from jax.experimental.pallas import tpu as pltpu


def _patch_embed_kernel(patches_ref, w_ref, b_ref, out_ref):
    # patches_ref: (TM, K_pad) bf16, w_ref: (E_pad, K_pad) bf16,
    # b_ref: (1, E_pad) f32, out_ref: (TM, E_pad) out_dtype.
    # Contract dim 1 of both operands (A @ B^T) -> f32 accumulation on MXU.
    acc = jax.lax.dot_general(
        patches_ref[...], w_ref[...],
        dimension_numbers=(((1,), (1,)), ((), ())),
        preferred_element_type=jnp.float32)
    out_ref[...] = (acc + b_ref[...]).astype(out_ref.dtype)


def _round_up(x, m):
    return ((x + m - 1) // m) * m


def _vmem_capacity_bytes():
    try:
        return int(pltpu.get_tpu_info().vmem_capacity_bytes)
    except Exception:
        return 64 << 20   # conservative fallback: v7x has the smallest VMEM


def _pick_tile_m(M, K_pad, E_pad, in_bytes, out_bytes, vmem_budget_bytes):
    """Largest 8/128-aligned row tile <= min(M_rounded, 1024) that fits VMEM.

    TM does NOT have to divide M (grid uses cdiv; last block is masked).
    """
    def vmem_est(tm):
        tiles = (2 * tm * K_pad * in_bytes          # double-buffered input tile
                 + 2 * tm * E_pad * out_bytes       # double-buffered output tile
                 + tm * E_pad * 4)                  # f32 accumulator / bias add
        const = K_pad * E_pad * in_bytes + E_pad * 4   # single-buffered w + bias
        return tiles + const

    cap = min(1024, _round_up(M, 8))
    # Keep >= 2 grid blocks for megacore (v7x) as long as TM stays >= 256.
    if M >= 512:
        cap = min(cap, max(256, _round_up(pl.cdiv(M, 2), 128)))

    for align in (128, 8):
        tm = (cap // align) * align
        while tm >= align:
            if vmem_est(tm) <= vmem_budget_bytes:
                return tm, vmem_est(tm)
            tm -= align
    tm = min(8, _round_up(M, 8))          # tiny / pathological problems
    return tm, vmem_est(tm)


def patch_embed(x, weight, bias, patch_size, *,
                compute_dtype=jnp.bfloat16, out_dtype=None):
    """x: (B, C, H, W); weight: (E, C, ph, pw); bias: (E,).

    Returns (B, num_patches, E) matching
    PatchEmbed.forward (proj -> flatten(2) -> transpose(1, 2)).
    """
    B, C, H, W = x.shape
    E = weight.shape[0]
    ph, pw = patch_size
    assert H % ph == 0 and W % pw == 0
    Hp, Wp = H // ph, W // pw
    P = Hp * Wp                      # num_patches
    K = C * ph * pw                  # per-patch feature dim
    M = B * P

    out_dtype = x.dtype if out_dtype is None else out_dtype
    in_bytes = jnp.dtype(compute_dtype).itemsize
    out_bytes = jnp.dtype(out_dtype).itemsize

    # Lane-dense output: pad E up to a multiple of 128 (no-op for 768/1024).
    E_pad = _round_up(E, 128)
    # Pad ragged K (> one lane group) to a 128 multiple for aligned contraction.
    K_pad = _round_up(K, 128) if (K > 128 and K % 128 != 0) else K

    # --- patch extraction (layout plumbing) ---
    # Cast to bf16 FIRST so any materialized relayout moves half the bytes;
    # allow_input_fusion asks XLA to fold this into the pallas_call operand.
    # NCHW -> (B, Hp, Wp, C, ph, pw) -> (B*P, K); feature order (c, i, j)
    # matches weight.reshape(E, K).
    patches = x.astype(compute_dtype).reshape(B, C, Hp, ph, Wp, pw)
    patches = patches.transpose(0, 2, 4, 1, 3, 5).reshape(M, K)
    if K_pad != K:
        patches = jnp.pad(patches, ((0, 0), (0, K_pad - K)))

    # Weight stays (E, K): no host-side transpose copy (kernel contracts dim 1).
    w_mat = weight.reshape(E, K).astype(compute_dtype)        # (E, K)
    b_row = bias.reshape(1, E).astype(jnp.float32)            # (1, E) f32
    if E_pad != E or K_pad != K:
        w_mat = jnp.pad(w_mat, ((0, E_pad - E), (0, K_pad - K)))
    if E_pad != E:
        b_row = jnp.pad(b_row, ((0, 0), (0, E_pad - E)))

    vmem_cap = _vmem_capacity_bytes()
    TM, vmem_est = _pick_tile_m(M, K_pad, E_pad, in_bytes, out_bytes,
                                vmem_budget_bytes=vmem_cap // 3)
    grid = (pl.cdiv(M, TM),)          # ragged last block is masked by Pallas

    out = pl.pallas_call(
        _patch_embed_kernel,
        out_shape=jax.ShapeDtypeStruct((M, E_pad), out_dtype),
        grid_spec=pltpu.PrefetchScalarGridSpec(
            num_scalar_prefetch=0,
            grid=grid,
            in_specs=[
                pl.BlockSpec((TM, K_pad), lambda i: (i, 0)),     # patch rows
                pl.BlockSpec((E_pad, K_pad), lambda i: (0, 0),   # full weight
                             pipeline_mode=pl.Buffered(1)),
                pl.BlockSpec((1, E_pad), lambda i: (0, 0),       # bias (f32)
                             pipeline_mode=pl.Buffered(1)),
            ],
            out_specs=pl.BlockSpec((TM, E_pad), lambda i: (i, 0)),
        ),
        compiler_params=pltpu.CompilerParams(
            dimension_semantics=("parallel",),   # shard M-axis across TCs
            vmem_limit_bytes=int(min(vmem_cap,
                                     max(2 * vmem_est, 32 << 20))),
            allow_input_fusion=[True, False, False],
        ),
        cost_estimate=pl.CostEstimate(
            flops=2 * M * K_pad * E_pad,
            transcendentals=0,
            bytes_accessed=(M * K_pad + E_pad * K_pad) * in_bytes
                           + E_pad * 4 + M * E_pad * out_bytes,
        ),
    )(patches, w_mat, b_row)

    if E_pad != E:
        # For standard ViT dims (E multiple of 128) this is a no-op; otherwise
        # the slice is expected to fuse into the consumer.
        out = out[:, :E]
    return out.reshape(B, P, E)


if __name__ == "__main__":
    # Small shapes consistent with PatchEmbed:
    # img_size=16, patch_size=4, in_chans=4, embed_dim=32
    B, C, H, W = 2, 4, 16, 16
    ph = pw = 4
    E = 32

    key = jax.random.PRNGKey(0)
    kx, kw, kb = jax.random.split(key, 3)
    x = jax.random.normal(kx, (B, C, H, W), dtype=jnp.float32)
    weight = jax.random.normal(kw, (E, C, ph, pw), dtype=jnp.float32) * 0.02
    bias = jax.random.normal(kb, (E,), dtype=jnp.float32) * 0.02

    out = patch_embed(x, weight, bias, (ph, pw))
    out = jax.block_until_ready(out)

    # Reference: lax conv (same semantics as the PyTorch module), f32.
    ref = jax.lax.conv_general_dilated(
        x, weight, window_strides=(ph, pw), padding="VALID",
        dimension_numbers=("NCHW", "OIHW", "NCHW"))
    ref = ref + bias.reshape(1, E, 1, 1)
    ref = ref.reshape(B, E, -1).transpose(0, 2, 1)  # flatten(2).transpose(1,2)

    assert out.shape == (B, (H // ph) * (W // pw), E)
    # bf16 inputs / f32 accumulation vs full-f32 reference -> loose tolerance.
    assert jnp.allclose(out, ref, atol=1e-2, rtol=1e-2), \
        float(jnp.max(jnp.abs(out - ref)))

    print("KERNEL_OK")
</pallas_src>

<mosaic_0001>
module attributes {stable_mosaic.version = 11 : i64} {
  func.func @_patch_embed_kernel(%arg0: i32, %arg1: memref<32x64xbf16, #tpu.memory_space<vmem>>, %arg2: memref<128x64xbf16, #tpu.memory_space<vmem>>, %arg3: memref<1x128xf32, #tpu.memory_space<vmem>>, %arg4: memref<32x128xf32, #tpu.memory_space<vmem>>) attributes {dimension_semantics = [#tpu.dimension_semantics<parallel>], iteration_bounds = array<i64: 1>, scalar_prefetch = 0 : i64, scratch_operands = 0 : i64, tpu.core_type = #tpu.core_type<tc>, window_params = [{transform_indices = @transform_0, window_bounds = array<i64: 32, 64>}, {pipeline_mode = #tpu.pipeline_mode<synchronous>, transform_indices = @transform_1, window_bounds = array<i64: 128, 64>}, {pipeline_mode = #tpu.pipeline_mode<synchronous>, transform_indices = @transform_2, window_bounds = array<i64: 1, 128>}, {transform_indices = @transform_3, window_bounds = array<i64: 32, 128>}]} {
    %c0 = arith.constant 0 : index
    %c0_0 = arith.constant 0 : index
    %0 = vector.load %arg1[%c0, %c0_0] : memref<32x64xbf16, #tpu.memory_space<vmem>>, vector<32x64xbf16>
    %c0_1 = arith.constant 0 : index
    %c0_2 = arith.constant 0 : index
    %1 = vector.load %arg2[%c0_1, %c0_2] : memref<128x64xbf16, #tpu.memory_space<vmem>>, vector<128x64xbf16>
    %cst = arith.constant dense<0.000000e+00> : vector<32x128xf32>
    %2 = tpu.matmul %0, %1, %cst {dimension_numbers = #tpu.dot_dimension_numbers<[1], [1], [0], [0], [0, 0, 1, 0], [], []>} : vector<32x64xbf16>, vector<128x64xbf16>, vector<32x128xf32> -> vector<32x128xf32>
    %c0_3 = arith.constant 0 : index
    %c0_4 = arith.constant 0 : index
    %3 = vector.load %arg3[%c0_3, %c0_4] : memref<1x128xf32, #tpu.memory_space<vmem>>, vector<1x128xf32>
    %4 = vector.broadcast %3 : vector<1x128xf32> to vector<32x128xf32>
    %5 = arith.addf %2, %4 : vector<32x128xf32>
    %c0_5 = arith.constant 0 : index
    %c0_6 = arith.constant 0 : index
    %6 = vector.load %arg4[%c0_5, %c0_6] : memref<32x128xf32, #tpu.memory_space<vmem>>, vector<32x128xf32>
    tpu.vector_store %arg4[%c0_5, %c0_6], %5 {strides = array<i32>} : memref<32x128xf32, #tpu.memory_space<vmem>>, vector<32x128xf32>,
    return
  }
  func.func @transform_0(%arg0: i32) -> (i32, i32) {
    %c0_i32 = arith.constant 0 : i32
    %c0_i32_0 = arith.constant 0 : i32
    return %arg0, %c0_i32 : i32, i32
  }
  func.func @transform_1(%arg0: i32) -> (i32, i32) {
    %c0_i32 = arith.constant 0 : i32
    %c0_i32_0 = arith.constant 0 : i32
    %c0_i32_1 = arith.constant 0 : i32
    return %c0_i32, %c0_i32_0 : i32, i32
  }
  func.func @transform_2(%arg0: i32) -> (i32, i32) {
    %c0_i32 = arith.constant 0 : i32
    %c0_i32_0 = arith.constant 0 : i32
    %c0_i32_1 = arith.constant 0 : i32
    return %c0_i32, %c0_i32_0 : i32, i32
  }
  func.func @transform_3(%arg0: i32) -> (i32, i32) {
    %c0_i32 = arith.constant 0 : i32
    %c0_i32_0 = arith.constant 0 : i32
    return %arg0, %c0_i32 : i32, i32
  }
}

</mosaic_0001>

<bundles_post_ra>
// kernel: tpu_custom_call.1
= control target key start
LH: loop header
LB: loop body
LE: loop exit
PB: predicated region body
PF: predicated region fallthrough
CT: control target
= control target key end

     0   :  { %vm93_vm0 = vcmask 523264   ;;  %s367_s0 = inlined_call_operand.vmem [shape: bf16[32,64], index: 0, kind: input, shape index: {}]   ;;  %s368_s1 = inlined_call_operand.vmem [shape: bf16[128,64], index: 1, kind: input, shape index: {}]   ;;  %s369_s2 = inlined_call_operand.vmem [shape: f32[1,128], index: 2, kind: input, shape index: {}]   ;;  %s370_s3 = inlined_call_operand.hbm [shape: f32[32,128], index: 3, kind: output, shape index: {}]  }
   0x1   :  { %v247_v0 = vld [vmem:[%s368_s1] sm:$0xff]   ;;  %v248_v1 = vld [vmem:[%s368_s1 + $0x8] sm:$0xff]   ;;  %v249_v3 = vld [vmem:[%s368_s1 + $0x10] sm:$0xff]  }
   0x2   :  { %236 = vmatprep.subr.msk.bf16.mxu0 %vm93_vm0, %v247_v0  ;;  %v101_v2 = vsel %vm93_vm0, %v247_v0, 0  ;;  %v104_v4 = vsel %vm93_vm0, %v248_v1, 0  ;;  %v255_v5 = vld [vmem:[%s367_s0] sm:$0xff]  }
   0x3   :  { %217 = vmatpush3.bf16.xpose.msra.mxu0 %v101_v2  ;;  %232 = vmatprep.mubr.msk.bf16.mxu0 %vm93_vm0, %v255_v5 }
   0x4   :  { %237 = vmatprep.subr.msk.bf16.mxu0 %vm93_vm0, %v248_v1 }
   0x5   :  { %8 = vsyncpa [#allocation3], 0  ;;  %v107_v6 = vsel %vm93_vm0, %v249_v3, 0  ;;  %v250_v7 = vld [vmem:[%s368_s1 + $0x18] sm:$0xff]   ;;  %v251_v9 = vld [vmem:[%s368_s1 + $0x20] sm:$0xff]   ;;  %s281_s7 = smov [#allocation2]  }
   0x6   :  { %v110_v8 = vsel %vm93_vm0, %v250_v7, 0  ;;  %v113_v10 = vsel %vm93_vm0, %v251_v9, 0  ;;  %v252_v11 = vld [vmem:[%s368_s1 + $0x28] sm:$0xff]   ;;  %v253_v13 = vld [vmem:[%s368_s1 + $0x30] sm:$0xff]   ;;  %v254_v15 = vld [vmem:[%s368_s1 + $0x38] sm:$0xff]   ;;  %s182_s8 = sshll.u32 %s281_s7, 4  ;;  %s183_s8 = int_to_ptr.vmem [resolvable:$true] %s182_s8 }
   0x7   :  { %v116_v12 = vsel %vm93_vm0, %v252_v11, 0  ;;  %v119_v14 = vsel %vm93_vm0, %v253_v13, 0  ;;  %v122_v16 = vsel %vm93_vm0, %v254_v15, 0  ;;  %v256_v17 = vld [vmem:[%s367_s0 + $0x8] sm:$0xff]   ;;  %v193_v18 = vld [vmem:[%s369_s2] ss:$0 sm:$0xff]  ;;  %p262_p1 = scmp.lt.s32.totalorder %s183_s8, %s183_s8 }
   0x8   :  { %s257_s0 = scalar_lea.vmem %s183_s8, 512 }
   0x9   :  { %p258_p0 = scmp.ne.s32.totalorder %s183_s8, %s257_s0  ;;  %p263_p2 = scmp.lt.s32.totalorder %s257_s0, %s257_s0 }
   0xb   :  { %219 = vmatpush3.bf16.xpose.msra.mxu0 %v104_v4  ;;  %p264_p3 = por %p263_p2, %p262_p1 }
   0xc   :  { %238 = vmatprep.subr.msk.bf16.mxu0 %vm93_vm0, %v249_v3 }
   0xd   :  { %p265_p4 = pnand %p264_p3, %p258_p0 }
  0x13   :  { %221 = vmatpush3.bf16.xpose.msra.mxu0 %v107_v6 }
  0x14   :  { %239 = vmatprep.subr.msk.bf16.mxu0 %vm93_vm0, %v250_v7 }
  0x1b   :  { %223 = vmatpush3.bf16.xpose.msra.mxu0 %v110_v8 }
  0x1c   :  { %240 = vmatprep.subr.msk.bf16.mxu0 %vm93_vm0, %v251_v9 }
  0x23   :  { %225 = vmatpush3.bf16.xpose.msra.mxu0 %v113_v10 }
  0x24   :  { %241 = vmatprep.subr.msk.bf16.mxu0 %vm93_vm0, %v252_v11 }
  0x2b   :  { %227 = vmatpush3.bf16.xpose.msra.mxu0 %v116_v12 }
  0x2c   :  { %242 = vmatprep.subr.msk.bf16.mxu0 %vm93_vm0, %v253_v13 }
  0x33   :  { %229 = vmatpush3.bf16.xpose.msra.mxu0 %v119_v14 }
  0x34   :  { %243 = vmatprep.subr.msk.bf16.mxu0 %vm93_vm0, %v254_v15 }
  0x3b   :  { %231 = vmatpush3.bf16.xpose.msra.mxu0 %v122_v16 }
  0x42   :  { %233 = vmatmul.mubr.msk.bf16.vlgmr.msra.gmra.mrb[0].mxu0 %vm93_vm0, %v256_v17 }
 0x115   :  { %v234_v19 = vpop.f32.mrb[0].mxu0 }
 0x116   :  { %v167_v20 = vadd.f32 %v234_v19, %v193_v18  ;;  %v158_v21 = vpop.f32.mrb[1].mxu0 }
 0x117   :  { %v159_v22 = vadd.f32 %v193_v18, %v158_v21  ;;  %v235_v23 = vpop.f32.mrb[2].mxu0 }
 0x118   :  { %175 = vst [vmem:[#allocation2 + $0x10] sm:$0xff] %v167_v20  ;;  %v170_v24 = vadd.f32 %v235_v23, %v193_v18  ;;  %v161_v25 = vpop.f32.mrb[3].mxu0 }
 0x119   :  { %173 = vst [vmem:[#allocation2] sm:$0xff] %v159_v22  ;;  %v162_v26 = vadd.f32 %v193_v18, %v161_v25 }
 0x11a   :  { %176 = vst [vmem:[#allocation2 + $0x18] sm:$0xff] %v170_v24 }
 0x11b   :  { %174 = vst [vmem:[#allocation2 + $0x8] sm:$0xff] %v162_v26 }
 0x11c   :  { %268 = shalt.err (!%p265_p4)
}
 0x11d   :  { %s269_s9 = scalar_lea.hbm %s370_s3, 512 }
 0x11e   :  { %p270_p5 = scmp.ne.s32.totalorder %s370_s3, %s269_s9  ;;  %p273_p6 = scmp.lt.u32.totalorder %s269_s9, %s370_s3 }
 0x120   :  { %p275_p7 = pnand %p273_p6, %p270_p5 }
 0x122   :  { %278 = shalt.err (!%p275_p7)
}
 0x123   :  { %s282_s14 = smov 128   ;;  %s283_s15 = smov 8  }
 0x124   :  { %188 = dma.vmem_to_hbm [thread:$0]  %s183_s8, 512, %s370_s3, [#allocation3], %s282_s14, %s282_s14, %s283_s15  }
 0x125   :  { %279 = dma.done.wait [#allocation3], 512  }
 0x126   :  { %280 = vsyncadd [#allocation3], 4294966784 }
 0x127   :  { %192 = vsyncpa [#allocation3], 1 }

</bundles_post_ra>
